<compile_context>
chip_gen: v7x
topology: tpu7x:2x2x1
jax: 0.10.0
libtpu: 0.0.40
codegen_flags: <defaults>
</compile_context>

<pallas_src>
import math

import jax
import jax.numpy as jnp
from jax.experimental import pallas as pl
from jax.experimental.pallas import tpu as pltpu


def _round_up(v, m):
    return (v + m - 1) // m * m


def _vmem_capacity_bytes():
    """Per-TensorCore VMEM capacity (128 MiB v5e/v6e, 64 MiB v7x)."""
    try:
        info = pltpu.get_tpu_info()
        for attr in ("vmem_capacity_bytes", "vmem_size_bytes", "vmem_bytes"):
            v = getattr(info, attr, None)
            if v:
                return int(v)
    except Exception:
        pass
    return 64 * 1024 * 1024  # conservative fallback (v7x per-TC VMEM)


def _pick_tiles(n_p, c_p, vmem_budget):
    """Pick (tm, tk) for the aggregate kernel against a VMEM budget."""
    # Row tile: largest of {512, 256, 128, 64} dividing n_p that still leaves
    # >= 2 row steps, so the "parallel" axis shards across v7x's 2 TensorCores.
    tm = 128
    for t in (512, 256, 128, 64):
        if n_p % t == 0 and n_p // t >= 2:
            tm = t
            break

    def footprint(tm_, tk_):
        return (2 * tm_ * tk_ * 1        # adj int8 tiles (double-buffered)
                + 2 * tk_ * c_p * 2      # xw bf16 tiles (double-buffered)
                + 4 * tm_ * c_p * 4      # bias + out f32 tiles (double-buffered)
                + 2 * tm_ * 4            # per-row scale tiles
                + tm_ * c_p * 4)         # f32 accumulator scratch

    # Contraction tile: largest of {2048 ... 128} dividing n_p that fits.
    tk = 128
    for t in (2048, 1024, 512, 256, 128):
        if n_p % t == 0 and footprint(tm, t) <= vmem_budget:
            tk = t
            break
    # Safety: shrink the row tile if even the minimum tk does not fit.
    while footprint(tm, tk) > vmem_budget and tm > 64:
        tm //= 2
    return tm, tk


def _project_kernel(x_ref, w_ref, xw_ref):
    # xw_tile = x_tile @ W   (f32 MXU accumulation, stored bf16 for stage 2)
    xw_ref[...] = jnp.dot(
        x_ref[...], w_ref[...], preferred_element_type=jnp.float32
    ).astype(xw_ref.dtype)


def _aggregate_kernel(adj_ref, xw_ref, scale_ref, b_ref, o_ref, acc_ref):
    # acc += adj[i, k] @ xw[k]   over the K grid axis; finalize at the last k.
    k = pl.program_id(1)

    @pl.when(k == 0)
    def _():
        acc_ref[...] = jnp.zeros_like(acc_ref)

    # int8 0/1 adjacency -> bf16 for the MXU (VPU cast, hidden under the DMA).
    a_bf16 = adj_ref[...].astype(jnp.bfloat16)
    acc_ref[...] += jnp.dot(a_bf16, xw_ref[...],
                            preferred_element_type=jnp.float32)

    @pl.when(k == pl.num_programs(1) - 1)
    def _():
        # Exact row normalization (1/degree) applied to the f32 accumulator,
        # then the bias add; output stays f32 like the torch module.
        o_ref[...] = (acc_ref[...] * scale_ref[...] + b_ref[...]).astype(
            o_ref.dtype)


def gcn_conv(x, weight, adj_support, row_scale, bias):
    """GCNConv forward: out = diag(row_scale) @ adj_support @ (x @ W) + bias.

    adj_support: (n, n) 0/1 connectivity (e.g. A + I), stored int8 in HBM.
    row_scale:   (n,) or (n, 1) f32 per-row normalization (e.g. 1/degree), so
                 diag(row_scale) @ adj_support is the usual row-normalized GCN
                 adjacency; this factorization is numerically exact.
    """
    n, f = x.shape
    f2, c = weight.shape
    assert f2 == f
    assert adj_support.shape == (n, n)
    assert bias.shape == (n, c)
    row_scale = jnp.reshape(row_scale, (n, 1)).astype(jnp.float32)

    # ---- pad to TPU-friendly shapes -------------------------------------
    n_p = _round_up(n, 128)   # node/adj dims -> multiple of 128
    c_p = _round_up(c, 128)   # out channels  -> full 128-lane tiles

    vmem_cap = _vmem_capacity_bytes()
    tm, tk = _pick_tiles(n_p, c_p, vmem_budget=int(0.8 * vmem_cap))

    x_p = jnp.pad(x, ((0, n_p - n), (0, 0))).astype(jnp.bfloat16)
    w_p = jnp.pad(weight, ((0, 0), (0, c_p - c))).astype(jnp.bfloat16)
    adj_p = jnp.pad(adj_support, ((0, n_p - n), (0, n_p - n))).astype(jnp.int8)
    s_p = jnp.pad(row_scale, ((0, n_p - n), (0, 0))).astype(jnp.float32)
    b_p = jnp.pad(bias, ((0, n_p - n), (0, c_p - c))).astype(jnp.float32)

    # ---- kernel 1: xw = x @ W  (tiny projection, bf16 output) ------------
    xw = pl.pallas_call(
        _project_kernel,
        out_shape=jax.ShapeDtypeStruct((n_p, c_p), jnp.bfloat16),
        grid_spec=pltpu.PrefetchScalarGridSpec(
            num_scalar_prefetch=0,
            grid=(n_p // tm,),
            in_specs=[
                pl.BlockSpec((tm, f), lambda i: (i, 0)),    # x row tile
                pl.BlockSpec((f, c_p), lambda i: (0, 0)),   # W (tiny, resident)
            ],
            out_specs=pl.BlockSpec((tm, c_p), lambda i: (i, 0)),
        ),
        compiler_params=pltpu.CompilerParams(
            dimension_semantics=("parallel",)),
    )(x_p, w_p)

    # ---- kernel 2: out = row_scale * (adj_support @ xw) + bias -----------
    grid = (n_p // tm, n_p // tk)

    vmem_needed = (2 * tm * tk * 1        # adj int8 tiles (double-buffered)
                   + 2 * tk * c_p * 2     # xw bf16 tiles (double-buffered)
                   + 4 * tm * c_p * 4     # bias + out f32 tiles
                   + 2 * tm * 4           # per-row scale tiles
                   + tm * c_p * 4         # accumulator scratch
                   + (2 << 20))           # headroom
    vmem_limit = int(min(max(vmem_needed, 32 << 20), int(0.9 * vmem_cap)))

    cost = pl.CostEstimate(
        flops=2 * n_p * n_p * c_p + 2 * n_p * c_p,
        transcendentals=0,
        bytes_accessed=(n_p * n_p * 1                   # adj (int8)
                        + (n_p // tm) * n_p * c_p * 2   # xw re-streamed per row tile
                        + n_p * c_p * 4                 # bias
                        + n_p * 4                       # row scale
                        + n_p * c_p * 4),               # out
    )

    out_p = pl.pallas_call(
        _aggregate_kernel,
        out_shape=jax.ShapeDtypeStruct((n_p, c_p), jnp.float32),
        grid_spec=pltpu.PrefetchScalarGridSpec(
            num_scalar_prefetch=0,
            grid=grid,
            in_specs=[
                pl.BlockSpec((tm, tk), lambda i, k: (i, k)),    # adj int8 tile
                pl.BlockSpec((tk, c_p), lambda i, k: (k, 0)),   # xw K slab
                pl.BlockSpec((tm, 1), lambda i, k: (i, 0)),     # 1/degree
                pl.BlockSpec((tm, c_p), lambda i, k: (i, 0)),   # bias
            ],
            out_specs=pl.BlockSpec((tm, c_p), lambda i, k: (i, 0)),
            scratch_shapes=[pltpu.VMEM((tm, c_p), jnp.float32)],
        ),
        compiler_params=pltpu.CompilerParams(
            dimension_semantics=("parallel", "arbitrary"),
            vmem_limit_bytes=vmem_limit),
        cost_estimate=cost,
    )(adj_p, xw, s_p, b_p)

    return out_p[:n, :c]


def make_params(key, num_nodes, num_features, out_channels):
    """Deterministic glorot weight + zero bias, matching reset_parameters()."""
    stdv = math.sqrt(6.0 / (num_features + out_channels))
    weight = jax.random.uniform(
        key, (num_features, out_channels), dtype=jnp.float32,
        minval=-stdv, maxval=stdv)
    bias = jnp.zeros((num_nodes, out_channels), dtype=jnp.float32)
    return weight, bias


def make_adjacency(key, num_nodes):
    """Deterministic 0/1 support (random edges + self loops) and 1/degree."""
    raw = jax.random.uniform(key, (num_nodes, num_nodes), dtype=jnp.float32)
    edges = (raw > 0.8).astype(jnp.float32)
    support = jnp.clip(edges + jnp.eye(num_nodes, dtype=jnp.float32), 0.0, 1.0)
    deg_inv = 1.0 / jnp.sum(support, axis=1)
    return support, deg_inv


if __name__ == "__main__":
    # Small shapes; num_nodes=300 pads to 384 so the run exercises padding,
    # the K-accumulation loop (3 k-steps) and a multi-step parallel row axis.
    num_nodes = 300
    num_features = 32
    out_channels = 64

    key = jax.random.PRNGKey(0)
    k_x, k_w, k_adj, k_b = jax.random.split(key, 4)

    x = jax.random.normal(k_x, (num_nodes, num_features), dtype=jnp.float32)
    weight, bias = make_params(k_w, num_nodes, num_features, out_channels)
    # The module zero-inits the bias; use a non-zero one here so the demo
    # actually exercises the bias-add path.
    bias = 0.1 * jax.random.normal(
        k_b, (num_nodes, out_channels), dtype=jnp.float32)
    support, deg_inv = make_adjacency(k_adj, num_nodes)

    out = gcn_conv(x, weight, support, deg_inv, bias)
    out = jax.block_until_ready(out)

    # Pure-JAX f32 reference of the module's forward semantics.
    adj_norm = support * deg_inv[:, None]          # row-normalized adjacency
    ref = adj_norm @ (x @ weight) + bias
    assert out.shape == (num_nodes, out_channels)
    # Adjacency path is exact (int8 0/1 + f32 row scale); remaining error is
    # only the bf16 x / W / xw rounding.
    assert jnp.allclose(out, ref, atol=2e-2, rtol=2e-2), float(
        jnp.max(jnp.abs(out - ref)))

    print("KERNEL_OK")
</pallas_src>

<mosaic_0001>
module attributes {stable_mosaic.version = 11 : i64} {
  func.func @_project_kernel(%arg0: i32, %arg1: memref<128x32xbf16, #tpu.memory_space<vmem>>, %arg2: memref<32x128xbf16, #tpu.memory_space<vmem>>, %arg3: memref<128x128xbf16, #tpu.memory_space<vmem>>) attributes {dimension_semantics = [#tpu.dimension_semantics<parallel>], iteration_bounds = array<i64: 3>, scalar_prefetch = 0 : i64, scratch_operands = 0 : i64, tpu.core_type = #tpu.core_type<tc>, window_params = [{transform_indices = @transform_0, window_bounds = array<i64: 128, 32>}, {pipeline_mode = #tpu.pipeline_mode<synchronous>, transform_indices = @transform_1, window_bounds = array<i64: 32, 128>}, {transform_indices = @transform_2, window_bounds = array<i64: 128, 128>}]} {
    %c0 = arith.constant 0 : index
    %c0_0 = arith.constant 0 : index
    %0 = vector.load %arg1[%c0, %c0_0] : memref<128x32xbf16, #tpu.memory_space<vmem>>, vector<128x32xbf16>
    %c0_1 = arith.constant 0 : index
    %c0_2 = arith.constant 0 : index
    %1 = vector.load %arg2[%c0_1, %c0_2] : memref<32x128xbf16, #tpu.memory_space<vmem>>, vector<32x128xbf16>
    %cst = arith.constant dense<0.000000e+00> : vector<128x128xf32>
    %2 = tpu.matmul %0, %1, %cst {dimension_numbers = #tpu.dot_dimension_numbers<[1], [0], [0], [1], [0, 0, 1, 1], [], []>} : vector<128x32xbf16>, vector<32x128xbf16>, vector<128x128xf32> -> vector<128x128xf32>
    %3 = arith.truncf %2 : vector<128x128xf32> to vector<128x128xbf16>
    %c0_3 = arith.constant 0 : index
    %c0_4 = arith.constant 0 : index
    %4 = vector.load %arg3[%c0_3, %c0_4] : memref<128x128xbf16, #tpu.memory_space<vmem>>, vector<128x128xbf16>
    tpu.vector_store %arg3[%c0_3, %c0_4], %3 {strides = array<i32>} : memref<128x128xbf16, #tpu.memory_space<vmem>>, vector<128x128xbf16>,
    return
  }
  func.func @transform_0(%arg0: i32) -> (i32, i32) {
    %c0_i32 = arith.constant 0 : i32
    %c0_i32_0 = arith.constant 0 : i32
    return %arg0, %c0_i32 : i32, i32
  }
  func.func @transform_1(%arg0: i32) -> (i32, i32) {
    %c0_i32 = arith.constant 0 : i32
    %c0_i32_0 = arith.constant 0 : i32
    %c0_i32_1 = arith.constant 0 : i32
    return %c0_i32, %c0_i32_0 : i32, i32
  }
  func.func @transform_2(%arg0: i32) -> (i32, i32) {
    %c0_i32 = arith.constant 0 : i32
    %c0_i32_0 = arith.constant 0 : i32
    return %arg0, %c0_i32 : i32, i32
  }
}

</mosaic_0001>

<bundles_post_ra>
// kernel: tpu_custom_call.1
= control target key start
LH: loop header
LB: loop body
LE: loop exit
PB: predicated region body
PF: predicated region fallthrough
CT: control target
= control target key end

     0   :  { %7 = vsyncpa [#allocation3], 0  ;;  %s893_s0 = inlined_call_operand.vmem [shape: bf16[384,32], index: 0, kind: input, shape index: {}]   ;;  %s894_s1 = inlined_call_operand.vmem [shape: bf16[32,128], index: 1, kind: input, shape index: {}]   ;;  %s895_s2 = inlined_call_operand.hbm [shape: bf16[384,128], index: 2, kind: output, shape index: {}]  }
   0x1   :  { %9 = vsyncpa [#allocation3 + $0x1], 0  ;;  %s773_s9 = smov 0   ;;  %s775_s10 = smov 0  }
   0x2   :  { %s777_s11 = smov 0   ;;  %s779_s12 = smov 0  }
   0x3 LB: > { %s794_s13 = sadd.s32 4294967295, %s753_s12   ;;  %s496_s14 = sadd.s32 4294967294, %s753_s12   ;;  %s753_s12 = sphi %s779_s12, %s901_s12   ;;  %s749_s11 = sphi %s777_s11, %s900_s11   ;;  %s745_s10 = sphi %s775_s10, %s899_s10   ;;  %s741_s9 = sphi %s773_s9, %s898_s9  }
   0x4   : > { %s798_s15 = sadd.s32 1, %s753_s12   ;;  %s69_s16 = sadd.s32 1, %s749_s11 }
   0x5   : > { %s66_s17 = ssub.s32 %s753_s12, %s798_s15  ;;  %p79_p0 = scmp.ne.s32.totalorder %s749_s11, %s745_s10 }
   0x6   : > { %p67_p1 = scmp.eq.s32.totalorder %s66_s17, 0  ;;  %p80_p2 = scmp.eq.s32.totalorder %s794_s13, 2 }
   0x7   : > { %p85_p3 = scmp.ne.s32.totalorder %s745_s10, %s741_s9  ;;  %p86_p4 = scmp.eq.s32.totalorder %s496_s14, 2 }
   0x8   : > { %s809_s18 = scalar_select %p67_p1, %s749_s11, %s69_s16  }
   0x9   : > { %p811_p5 = por %p80_p2, %p79_p0  ;;  %p815_p6 = por %p86_p4, %p85_p3 }
   0xa   : > { %p499_p7 = scmp.ge.s32.totalorder %s753_s12, 1  ;;  %p116_p8 = scmp.lt.s32.totalorder %s753_s12, 4 }
   0xc   : > { %p117_p9 = pnand %p499_p7, %p116_p8 }
   0xd   : > { %v681_v0 = vld [vmem:[%s894_s1] sm:$0xff] (!%p117_p9)   ;;  %s501_s23 = sshll.u32 (!%p117_p9), %s794_s13, 4  ;;  %v682_v1 = vld [vmem:[%s894_s1 + $0x8] sm:$0xff] (!%p117_p9)   ;;  %vm218_vm0 = vcmask (!%p117_p9), 261120   ;;  %s135_s30 = sand.u32 (!%p117_p9), 1, %s745_s10  }
   0xe   : > { %120 = sbr.rel (%p117_p9) target bundleno = 267 (0x10b), region = 28  ;;  %p139_p10 = scmp.lt.s32.totalorder (!%p117_p9), %s501_s23, 47  ;;  %616 = vmatprep.subr.bf16.mxu0 (!%p117_p9), %v681_v0  ;;  %636 = vmatprep.subr.bf16.mxu1 (!%p117_p9), %v681_v0 }
   0xf   : > { %617 = vmatpush3.bf16.msra.mxu0 (!%p117_p9), %v681_v0  ;;  %638 = vmatpush3.bf16.msra.mxu1 (!%p117_p9), %v681_v0  ;;  %s500_s3 = sshll.u32 (!%p117_p9), %s135_s30, 6  ;;  %s558_s5 = sshll.u32 (!%p117_p9), %s794_s13, 10 }
  0x10   : > { %618 = vmatprep.subr.bf16.mxu0 (!%p117_p9), %v682_v1  ;;  %637 = vmatprep.subr.bf16.mxu1 (!%p117_p9), %v682_v1  ;;  %s137_s4 = scalar_lea.vmem (!%p117_p9), [#allocation2], %s500_s3  ;;  %s846_s14 = scalar_lea.hbm (!%p117_p9), %s895_s2, %s558_s5 }
  0x11   : > { %s434_s6 = sshll.u32 (!%p117_p9), %s137_s4, 4  ;;  %s852_s13 = scalar_lea.sflag (!%p117_p9), [#allocation3], %s135_s30  ;;  %s848_s6 = int_to_ptr.vmem [resolvable:$true] %s434_s6 }
  0x12   : > { %s691_s16 = scalar_lea.vmem (!%p117_p9), %s848_s6, 1024  ;;  %s755_s17 = smov (!%p117_p9), [#allocation2]  }
  0x13   : > { %619 = vmatpush3.bf16.msra.mxu0 (!%p117_p9), %v682_v1  ;;  %639 = vmatpush3.bf16.msra.mxu1 (!%p117_p9), %v682_v1  ;;  %p692_p11 = scmp.ne.s32.totalorder (!%p117_p9), %s848_s6, %s691_s16  ;;  %s695_s21 = sshll.u32 (!%p117_p9), %s755_s17, 4  ;;  %s696_s21 = int_to_ptr.vmem [resolvable:$false] %s695_s21 }
  0x14   : > { %s697_s22 = scalar_lea.vmem (!%p117_p9), %s696_s21, 2048  ;;  %p698_p0 = scmp.lt.s32.totalorder (!%p117_p9), %s848_s6, %s696_s21 }
  0x15   : > { %s903_s23 = smov (!%p139_p10, %s501_s23), 47  ;;  %p693_p12 = pnand %p692_p11, %p811_p5 }
  0x16   : > { %s502_s26 = sshll.u32 %s903_s23, 2  ;;  %p699_p1 = scmp.lt.s32.totalorder %s697_s22, %s691_s16 }
  0x17   : > { %s142_s29 = scalar_lea.vmem %s893_s0, %s502_s26  ;;  %p694_p13 = pneg %p693_p12 }
  0x18   : > { %v683_v2 = vld [vmem:[%s142_s29] sm:$0xff]   ;;  %v685_v4 = vld [vmem:[%s142_s29 + $0x8] sm:$0xff]   ;;  %v687_v6 = vld [vmem:[%s142_s29 + $0x10] sm:$0xff]   ;;  %p700_p2 = por %p699_p1, %p698_p0 }
  0x19   : > { %v684_v3 = vld [vmem:[%s142_s29 + $0x20] sm:$0xff]   ;;  %620 = vmatprep.mubr.msk.bf16.mxu0 %vm218_vm0, %v683_v2  ;;  %v686_v5 = vld [vmem:[%s142_s29 + $0x28] sm:$0xff]   ;;  %v688_v7 = vld [vmem:[%s142_s29 + $0x30] sm:$0xff]  }
  0x1a   : > { %628 = vmatprep.mubr.msk.bf16.mxu1 %vm218_vm0, %v684_v3  ;;  %621 = vmatmul.mubr.msk.bf16.vlgmr.msra.gmra.mrb[0].mxu0 %vm218_vm0, %v685_v4  ;;  %v689_v8 = vld [vmem:[%s142_s29 + $0x18] sm:$0xff]   ;;  %p701_p3 = pnand %p700_p2, %p694_p13 }
  0x1b   : > { %629 = vmatmul.mubr.msk.bf16.vlgmr.msra.gmra.mrb[0].mxu1 %vm218_vm0, %v686_v5  ;;  %624 = vmatprep.mubr.msk.bf16.mxu0 %vm218_vm0, %v687_v6  ;;  %v690_v9 = vld [vmem:[%s142_s29 + $0x38] sm:$0xff]  }
  0x1c   : > { %632 = vmatprep.mubr.msk.bf16.mxu1 %vm218_vm0, %v688_v7 }
  0x22   : > { %625 = vmatmul.mubr.msk.bf16.gmra.mrb[4].mxu0 %vm218_vm0, %v689_v8 }
  0x23   : > { %633 = vmatmul.mubr.msk.bf16.gmra.mrb[4].mxu1 %vm218_vm0, %v690_v9 }
  0xed   : > { %v622_v10 = vpop.f32.mrb[0].mxu0 }
  0xee   : > { %v630_v11 = vpop.f32.mrb[0].mxu1  ;;  %v277_v12 = vpop.f32.mrb[1].mxu0 }
  0xef   : > { %v309_v13 = vpop.f32.mrb[1].mxu1  ;;  %v623_v14 = vpop.f32.mrb[2].mxu0 }
  0xf0   : > { %v567_v15 = vpack.c.bf16 %v623_v14, %v622_v10  ;;  %v631_v16 = vpop.f32.mrb[2].mxu1  ;;  %v280_v17 = vpop.f32.mrb[3].mxu0 }
  0xf1   : > { %v587_v18 = vpack.c.bf16 %v631_v16, %v630_v11  ;;  %v562_v19 = vpack.c.bf16 %v280_v17, %v277_v12  ;;  %v312_v20 = vpop.f32.mrb[3].mxu1 }
  0xf2   : > { %599 = vst [vmem:[%s137_s4 + $0x8] sm:$0xff] %v567_v15   ;;  %v582_v21 = vpack.c.bf16 %v312_v20, %v309_v13 }
  0xf3   : > { %603 = vst [vmem:[%s137_s4 + $0x28] sm:$0xff] %v587_v18   ;;  %563 = vst [vmem:[%s137_s4] sm:$0xff] %v562_v19  }
  0xf4   : > { %602 = vst [vmem:[%s137_s4 + $0x20] sm:$0xff] %v582_v21  }
  0xf5   : > { %v626_v22 = vpop.f32.mrb[4].mxu0 }
  0xf6   : > { %v634_v23 = vpop.f32.mrb[4].mxu1  ;;  %v293_v24 = vpop.f32.mrb[5].mxu0 }
  0xf7   : > { %v325_v25 = vpop.f32.mrb[5].mxu1  ;;  %v627_v26 = vpop.f32.mrb[6].mxu0 }
  0xf8   : > { %v577_v27 = vpack.c.bf16 %v627_v26, %v626_v22  ;;  %v635_v28 = vpop.f32.mrb[6].mxu1  ;;  %v296_v29 = vpop.f32.mrb[7].mxu0 }
  0xf9   : > { %v597_v30 = vpack.c.bf16 %v635_v28, %v634_v23  ;;  %v572_v31 = vpack.c.bf16 %v296_v29, %v293_v24  ;;  %v328_v32 = vpop.f32.mrb[7].mxu1 }
  0xfa   : > { %601 = vst [vmem:[%s137_s4 + $0x18] sm:$0xff] %v577_v27   ;;  %v592_v33 = vpack.c.bf16 %v328_v32, %v325_v25 }
  0xfb   : > { %605 = vst [vmem:[%s137_s4 + $0x38] sm:$0xff] %v597_v30   ;;  %600 = vst [vmem:[%s137_s4 + $0x10] sm:$0xff] %v572_v31  }
  0xfc   : > { %604 = vst [vmem:[%s137_s4 + $0x30] sm:$0xff] %v592_v33  }
  0xfd   : > { %704 = shalt.err (!%p701_p3)
}
  0xfe   : > { %s705_s23 = scalar_lea.hbm %s846_s14, 1024  ;;  %s709_s26 = scalar_lea.hbm %s895_s2, 3072 }
  0xff   : > { %p706_p4 = scmp.ne.s32.totalorder %s846_s14, %s705_s23  ;;  %p710_p9 = scmp.lt.u32.totalorder %s846_s14, %s895_s2 }
 0x100   : > { %p711_p10 = scmp.lt.u32.totalorder %s709_s26, %s705_s23  ;;  %p713_p12 = scmp.lt.u32.totalorder %s705_s23, %s846_s14 }
 0x101   : > { %p707_p7 = pnand %p706_p4, %p811_p5 }
 0x102   : > { %p712_p11 = por %p711_p10, %p710_p9 }
 0x103   : > { %p708_p8 = pneg %p707_p7 }
 0x104   : > { %p714_p13 = por %p713_p12, %p712_p11 }
 0x106   : > { %p715_p0 = pnand %p714_p13, %p708_p8 }
 0x108   : > { %718 = shalt.err (!%p715_p0)
}
 0x109   : > { %s756_s29 = smov 64   ;;  %s757_s30 = smov 4  }
 0x10a   : > { %640 = dma.vmem_to_hbm [thread:$0]  (%p811_p5), %s848_s6, 1024, %s846_s14, %s852_s13, %s756_s29, %s756_s29, %s757_s30  }
 0x10b PF: > { %p646_p1 = scmp.ge.s32.totalorder %s753_s12, 2  ;;  %s449_s3 = sand.u32 1, %s741_s9  }
 0x10c   : > { %s450_s4 = scalar_lea.sflag [#allocation3], %s449_s3 }
 0x10d   : > { %p643_p2 = pnand %p646_p1, %p815_p6 }
 0x10f   : > { %736 = dma.done.wait (!%p643_p2), %s450_s4, 1024  }
 0x110   : > { %738 = vsyncadd (!%p643_p2), %s450_s4, 4294966272  ;;  %p12_p3 = scmp.ge.s32.totalorder %s798_s15, 5   ;;  %s898_s9 = smov %s745_s10 }
 0x111   : > { %s899_s10 = smov %s749_s11  ;;  %s900_s11 = smov %s809_s18 }
 0x112   : > { %s901_s12 = smov %s798_s15  ;;  %14 = sbr.rel (!%p12_p3) target bundleno = 3 (0x3), region = 63 }
 0x119   :  { %455 = vsyncpa [#allocation3], 1 }
 0x11a   :  { %457 = vsyncpa [#allocation3 + $0x1], 1 }

</bundles_post_ra>
